<compile_context>
chip_gen: v7x
topology: tpu7x:2x2x1
jax: 0.10.0
libtpu: 0.0.40
codegen_flags: <defaults>
</compile_context>

<pallas_src>
import functools

import jax
import jax.numpy as jnp
from jax.experimental import pallas as pl
from jax.experimental.pallas import tpu as pltpu


def _round_up(x, m):
    return ((x + m - 1) // m) * m


# ---------------------------------------------------------------------------
# Pallas kernel: one destination-node-type group.
# ---------------------------------------------------------------------------

def _rgcn_group_kernel(src_ids_ref, a_ref, x_ref, w_ref, b_ref, o_ref,
                       *, apply_relu, ax_first):
    """Grid = (Nd_tiles, R, Ns_tiles).  o_ref is the f32 accumulator (VMEM-resident
    across the r/ns reduction axes).  src_ids_ref is only used by the index_maps."""
    r = pl.program_id(1)
    ns = pl.program_id(2)

    # Zero the accumulator on the first reduction step of this output tile.
    @pl.when((r == 0) & (ns == 0))
    def _():
        o_ref[...] = jnp.zeros_like(o_ref)

    a = a_ref[...]          # (TNd, TNs) bf16   normalized adjacency tile
    x = x_ref[...]          # (TNs, Fp)  bf16   source-feature tile (dedup'd by src type)
    w = w_ref[...]          # (Fp, Hp)   bf16   per-relation weight

    if ax_first:            # F < H: multiply the dense adjacency by the narrower operand first
        ax = jnp.dot(a, x, preferred_element_type=jnp.float32)                   # (TNd, Fp)
        msg = jnp.dot(ax.astype(jnp.bfloat16), w, preferred_element_type=jnp.float32)
    else:                   # H <= F: X@W first, then A @ (XW)
        xw = jnp.dot(x, w, preferred_element_type=jnp.float32)                   # (TNs, Hp)
        msg = jnp.dot(a, xw.astype(jnp.bfloat16), preferred_element_type=jnp.float32)

    o_ref[...] += msg

    # Finalize: hoisted bias sum + optional ReLU, written in place.
    @pl.when((r == pl.num_programs(1) - 1) & (ns == pl.num_programs(2) - 1))
    def _():
        out = o_ref[...] + b_ref[...]
        if apply_relu:
            out = jnp.maximum(out, 0.0)
        o_ref[...] = out


def hetero_graphconv_sum(A, X, W, b_sum, src_ids, *, apply_relu):
    """A: (R, Nd, Ns) normalized adjacencies; X: (S, Ns, F) unique per-src-type features;
    W: (R, F, H); b_sum: (1, H) = sum_r b_r; src_ids: (R,) int32 mapping relation -> src slot.
    Returns (Nd, H) = ReLU?( sum_r A_r @ X[src_ids[r]] @ W_r + b_sum )."""
    R, Nd, Ns = A.shape
    S, _, F = X.shape
    H = W.shape[-1]

    # Lane-dense feature padding (unmasked stores, full MXU columns).
    Fp = _round_up(F, 128)
    Hp = _round_up(H, 128)

    # Tile the destination and contraction axes; tiles stay well inside the default
    # scoped-VMEM budget on v5e/v6e (128 MiB) and v7x (64 MiB).
    if Nd <= 256:
        TNd = _round_up(Nd, 8)
        Nd_pad = TNd
    else:
        TNd = 256
        Nd_pad = _round_up(Nd, TNd)
    if Ns <= 512:
        TNs = _round_up(Ns, 128)
        Ns_pad = TNs
    else:
        TNs = 512
        Ns_pad = _round_up(Ns, TNs)

    # bf16 inputs (DMA/MXU), zero-padded so padding contributes nothing.
    A_p = jnp.pad(A, ((0, 0), (0, Nd_pad - Nd), (0, Ns_pad - Ns))).astype(jnp.bfloat16)
    X_p = jnp.pad(X, ((0, 0), (0, Ns_pad - Ns), (0, Fp - F))).astype(jnp.bfloat16)
    W_p = jnp.pad(W, ((0, 0), (0, Fp - F), (0, Hp - H))).astype(jnp.bfloat16)
    b_p = jnp.pad(b_sum, ((0, 0), (0, Hp - H))).astype(jnp.float32)

    ax_first = F < H   # keep the Nd*Ns-sized matmul on the cheaper feature width

    nnd = Nd_pad // TNd
    nns = Ns_pad // TNs
    grid = (nnd, R, nns)

    if ax_first:
        flops = 2 * R * (Nd_pad * Ns_pad * Fp + nns * Nd_pad * Fp * Hp)
    else:
        flops = 2 * R * (nnd * Ns_pad * Fp * Hp + Nd_pad * Ns_pad * Hp)
    bytes_accessed = (A_p.size * 2 + nnd * R * Ns_pad * Fp * 2
                      + nnd * nns * R * Fp * Hp * 2 + Nd_pad * Hp * 4)

    kernel = functools.partial(_rgcn_group_kernel,
                               apply_relu=apply_relu, ax_first=ax_first)

    out = pl.pallas_call(
        kernel,
        out_shape=jax.ShapeDtypeStruct((Nd_pad, Hp), jnp.float32),
        grid_spec=pltpu.PrefetchScalarGridSpec(
            num_scalar_prefetch=1,
            grid=grid,
            in_specs=[
                # relation axis squeezed out (None) -> kernel sees 2-D tiles
                pl.BlockSpec((None, TNd, TNs), lambda nd, r, ns, sid: (r, nd, ns)),
                pl.BlockSpec((None, TNs, Fp), lambda nd, r, ns, sid: (sid[r], ns, 0)),
                pl.BlockSpec((None, Fp, Hp), lambda nd, r, ns, sid: (r, 0, 0)),
                pl.BlockSpec((1, Hp), lambda nd, r, ns, sid: (0, 0)),
            ],
            out_specs=pl.BlockSpec((TNd, Hp), lambda nd, r, ns, sid: (nd, 0)),
        ),
        compiler_params=pltpu.CompilerParams(
            dimension_semantics=("parallel", "arbitrary", "arbitrary")),
        cost_estimate=pl.CostEstimate(flops=flops, transcendentals=0,
                                      bytes_accessed=bytes_accessed),
    )(src_ids, A_p, X_p, W_p, b_p)

    return out[:Nd, :H]


# ---------------------------------------------------------------------------
# RGCN module glue (plain JAX): graph bookkeeping, parameter init, layer loop.
# ---------------------------------------------------------------------------

def normalize_adj(A):
    """DGL GraphConv norm='both' on a dense (N_dst, N_src) 0/1 adjacency."""
    out_deg = jnp.clip(jnp.sum(A, axis=0), 1.0, None)   # out-degree of src nodes
    in_deg = jnp.clip(jnp.sum(A, axis=1), 1.0, None)    # in-degree of dst nodes
    return A * (in_deg[:, None] ** -0.5) * (out_deg[None, :] ** -0.5)


def init_graphconv_params(key, rel_names, fin, fout):
    """Per-relation GraphConv params: xavier-uniform weight.  (DGL default bias is zeros;
    small non-zero bias used here only so the bias path is actually exercised.)"""
    params = {}
    for i, rel in enumerate(rel_names):
        k = jax.random.fold_in(key, i)
        bound = (6.0 / (fin + fout)) ** 0.5
        params[rel] = {
            "W": jax.random.uniform(k, (fin, fout), jnp.float32, -bound, bound),
            "b": 0.01 * jax.random.normal(jax.random.fold_in(k, 1), (fout,), jnp.float32),
        }
    return params


def _hetero_layer(graph, feats, params, apply_relu):
    """graph: {rel_name: (src_type, dst_type, A_hat)}; feats: {ntype: (N, F)}."""
    by_dst = {}
    for rel, (src, dst, A) in graph.items():
        by_dst.setdefault(dst, []).append((rel, src, A))
    out = {}
    for dst, rels in by_dst.items():
        # unique source node types for this dst group (features DMA'd once, not per relation)
        src_types = []
        for _, src, _ in rels:
            if src not in src_types:
                src_types.append(src)
        ns_max = max(feats[s].shape[0] for s in src_types)
        X = jnp.stack([jnp.pad(feats[s], ((0, ns_max - feats[s].shape[0]), (0, 0)))
                       for s in src_types])                                    # (S, Ns, F)
        A = jnp.stack([jnp.pad(a, ((0, 0), (0, ns_max - a.shape[1])))
                       for _, _, a in rels])                                   # (R, Nd, Ns)
        W = jnp.stack([params[rel]["W"] for rel, _, _ in rels])                # (R, F, H)
        b_sum = sum(params[rel]["b"] for rel, _, _ in rels)[None, :]           # (1, H)
        src_ids = jnp.array([src_types.index(s) for _, s, _ in rels], jnp.int32)
        out[dst] = hetero_graphconv_sum(A, X, W, b_sum, src_ids, apply_relu=apply_relu)
    return out


def rgcn_forward(graph, inputs, params1, params2):
    h = _hetero_layer(graph, inputs, params1, apply_relu=True)   # conv1 + ReLU
    h = _hetero_layer(graph, h, params2, apply_relu=False)       # conv2
    return h


def rgcn_forward_ref(graph, inputs, params1, params2):
    """Pure-JAX reference with the same bf16-input / f32-accumulate numerics as the kernel."""
    def layer(feats, params, apply_relu):
        out = {}
        for rel, (src, dst, A) in graph.items():
            a = A.astype(jnp.bfloat16)
            x = feats[src].astype(jnp.bfloat16)
            w = params[rel]["W"].astype(jnp.bfloat16)
            fin, fout = params[rel]["W"].shape
            if fin < fout:
                ax = jnp.dot(a, x, preferred_element_type=jnp.float32)
                y = jnp.dot(ax.astype(jnp.bfloat16), w, preferred_element_type=jnp.float32)
            else:
                xw = jnp.dot(x, w, preferred_element_type=jnp.float32)
                y = jnp.dot(a, xw.astype(jnp.bfloat16), preferred_element_type=jnp.float32)
            y = y + params[rel]["b"]
            out[dst] = out.get(dst, 0.0) + y
        if apply_relu:
            out = {k: jnp.maximum(v, 0.0) for k, v in out.items()}
        return out
    h = layer(inputs, params1, True)
    return layer(h, params2, False)


if __name__ == "__main__":
    key = jax.random.PRNGKey(0)

    # Synthetic heterograph: 2 node types, 3 relation types.
    N = 32                      # nodes per node type
    in_feats, hid_feats, out_feats = 16, 32, 8
    rel_defs = [
        ("follows", "user", "user"),
        ("clicks", "user", "item"),
        ("clicked-by", "item", "user"),
    ]
    rel_names = [r for r, _, _ in rel_defs]

    # Random 0/1 adjacencies, normalized like DGL GraphConv (norm='both').
    graph = {}
    for i, (rel, src, dst) in enumerate(rel_defs):
        ka = jax.random.fold_in(key, 100 + i)
        A = (jax.random.uniform(ka, (N, N)) < 0.25).astype(jnp.float32)   # (N_dst, N_src)
        graph[rel] = (src, dst, normalize_adj(A))

    # Node features per node type.
    inputs = {
        "user": jax.random.normal(jax.random.fold_in(key, 1), (N, in_feats), jnp.float32),
        "item": jax.random.normal(jax.random.fold_in(key, 2), (N, in_feats), jnp.float32),
    }

    # Per-relation GraphConv parameters (conv1: in->hid, conv2: hid->out).
    params1 = init_graphconv_params(jax.random.fold_in(key, 10), rel_names, in_feats, hid_feats)
    params2 = init_graphconv_params(jax.random.fold_in(key, 20), rel_names, hid_feats, out_feats)

    out = rgcn_forward(graph, inputs, params1, params2)
    out = jax.tree_util.tree_map(jax.block_until_ready, out)

    ref = rgcn_forward_ref(graph, inputs, params1, params2)
    for ntype in out:
        assert out[ntype].shape == (N, out_feats), (ntype, out[ntype].shape)
        assert jnp.allclose(out[ntype], ref[ntype], atol=2e-2, rtol=2e-2), ntype

    print("KERNEL_OK")
</pallas_src>

<mosaic_0001>
module attributes {stable_mosaic.version = 11 : i64} {
  func.func @_rgcn_group_kernel(%arg0: i32, %arg1: i32, %arg2: i32, %arg3: memref<2xi32, #tpu.memory_space<smem>>, %arg4: memref<1x32x128xbf16, #tpu.memory_space<vmem>>, %arg5: memref<1x128x128xbf16, #tpu.memory_space<vmem>>, %arg6: memref<1x128x128xbf16, #tpu.memory_space<vmem>>, %arg7: memref<1x128xf32, #tpu.memory_space<vmem>>, %arg8: memref<32x128xf32, #tpu.memory_space<vmem>>) attributes {dimension_semantics = [#tpu.dimension_semantics<parallel>, #tpu.dimension_semantics<arbitrary>, #tpu.dimension_semantics<arbitrary>], iteration_bounds = array<i64: 1, 2, 1>, scalar_prefetch = 1 : i64, scratch_operands = 0 : i64, tpu.core_type = #tpu.core_type<tc>, window_params = [{transform_indices = @transform_0, window_bounds = array<i64: 1, 32, 128>}, {transform_indices = @transform_1, window_bounds = array<i64: 1, 128, 128>}, {transform_indices = @transform_2, window_bounds = array<i64: 1, 128, 128>}, {pipeline_mode = #tpu.pipeline_mode<synchronous>, transform_indices = @transform_3, window_bounds = array<i64: 1, 128>}, {transform_indices = @transform_4, window_bounds = array<i64: 32, 128>}]} {
    %c0_i32 = arith.constant 0 : i32
    %0 = arith.cmpi eq, %arg1, %c0_i32 : i32
    %c0_i32_0 = arith.constant 0 : i32
    %1 = arith.cmpi eq, %arg2, %c0_i32_0 : i32
    %2 = arith.andi %0, %1 : i1
    %3 = arith.extui %2 : i1 to i32
    %c0_i32_1 = arith.constant 0 : i32
    %4 = arith.cmpi ne, %3, %c0_i32_1 : i32
    scf.if %4 {
      %cst_17 = arith.constant 0.000000e+00 : f32
      %22 = vector.broadcast %cst_17 : f32 to vector<32x128xf32>
      %c0_18 = arith.constant 0 : index
      %c0_19 = arith.constant 0 : index
      %23 = vector.load %arg8[%c0_18, %c0_19] : memref<32x128xf32, #tpu.memory_space<vmem>>, vector<32x128xf32>
      tpu.vector_store %arg8[%c0_18, %c0_19], %22 {strides = array<i32>} : memref<32x128xf32, #tpu.memory_space<vmem>>, vector<32x128xf32>,
    } else {
    }
    %c0 = arith.constant 0 : index
    %c0_2 = arith.constant 0 : index
    %c0_3 = arith.constant 0 : index
    %5 = vector.load %arg4[%c0, %c0_2, %c0_3] : memref<1x32x128xbf16, #tpu.memory_space<vmem>>, vector<1x32x128xbf16>
    %6 = vector.shape_cast %5 : vector<1x32x128xbf16> to vector<32x128xbf16>
    %c0_4 = arith.constant 0 : index
    %c0_5 = arith.constant 0 : index
    %c0_6 = arith.constant 0 : index
    %7 = vector.load %arg5[%c0_4, %c0_5, %c0_6] : memref<1x128x128xbf16, #tpu.memory_space<vmem>>, vector<1x128x128xbf16>
    %8 = vector.shape_cast %7 : vector<1x128x128xbf16> to vector<128x128xbf16>
    %c0_7 = arith.constant 0 : index
    %c0_8 = arith.constant 0 : index
    %c0_9 = arith.constant 0 : index
    %9 = vector.load %arg6[%c0_7, %c0_8, %c0_9] : memref<1x128x128xbf16, #tpu.memory_space<vmem>>, vector<1x128x128xbf16>
    %10 = vector.shape_cast %9 : vector<1x128x128xbf16> to vector<128x128xbf16>
    %cst = arith.constant dense<0.000000e+00> : vector<32x128xf32>
    %11 = tpu.matmul %6, %8, %cst {dimension_numbers = #tpu.dot_dimension_numbers<[1], [0], [0], [1], [0, 0, 1, 1], [], []>} : vector<32x128xbf16>, vector<128x128xbf16>, vector<32x128xf32> -> vector<32x128xf32>
    %12 = arith.truncf %11 : vector<32x128xf32> to vector<32x128xbf16>
    %cst_10 = arith.constant dense<0.000000e+00> : vector<32x128xf32>
    %13 = tpu.matmul %12, %10, %cst_10 {dimension_numbers = #tpu.dot_dimension_numbers<[1], [0], [0], [1], [0, 0, 1, 1], [], []>} : vector<32x128xbf16>, vector<128x128xbf16>, vector<32x128xf32> -> vector<32x128xf32>
    %c0_11 = arith.constant 0 : index
    %c0_12 = arith.constant 0 : index
    %14 = vector.load %arg8[%c0_11, %c0_12] : memref<32x128xf32, #tpu.memory_space<vmem>>, vector<32x128xf32>
    %15 = arith.addf %14, %13 : vector<32x128xf32>
    %c0_13 = arith.constant 0 : index
    %c0_14 = arith.constant 0 : index
    %16 = vector.load %arg8[%c0_13, %c0_14] : memref<32x128xf32, #tpu.memory_space<vmem>>, vector<32x128xf32>
    tpu.vector_store %arg8[%c0_13, %c0_14], %15 {strides = array<i32>} : memref<32x128xf32, #tpu.memory_space<vmem>>, vector<32x128xf32>,
    %c1_i32 = arith.constant 1 : i32
    %17 = arith.cmpi eq, %arg1, %c1_i32 : i32
    %c0_i32_15 = arith.constant 0 : i32
    %18 = arith.cmpi eq, %arg2, %c0_i32_15 : i32
    %19 = arith.andi %17, %18 : i1
    %20 = arith.extui %19 : i1 to i32
    %c0_i32_16 = arith.constant 0 : i32
    %21 = arith.cmpi ne, %20, %c0_i32_16 : i32
    scf.if %21 {
      %c0_17 = arith.constant 0 : index
      %c0_18 = arith.constant 0 : index
      %22 = vector.load %arg8[%c0_17, %c0_18] : memref<32x128xf32, #tpu.memory_space<vmem>>, vector<32x128xf32>
      %c0_19 = arith.constant 0 : index
      %c0_20 = arith.constant 0 : index
      %23 = vector.load %arg7[%c0_19, %c0_20] : memref<1x128xf32, #tpu.memory_space<vmem>>, vector<1x128xf32>
      %24 = vector.broadcast %23 : vector<1x128xf32> to vector<32x128xf32>
      %25 = arith.addf %22, %24 : vector<32x128xf32>
      %cst_21 = arith.constant 0.000000e+00 : f32
      %26 = vector.broadcast %cst_21 : f32 to vector<32x128xf32>
      %27 = arith.maximumf %25, %26 : vector<32x128xf32>
      %c0_22 = arith.constant 0 : index
      %c0_23 = arith.constant 0 : index
      %28 = vector.load %arg8[%c0_22, %c0_23] : memref<32x128xf32, #tpu.memory_space<vmem>>, vector<32x128xf32>
      tpu.vector_store %arg8[%c0_22, %c0_23], %27 {strides = array<i32>} : memref<32x128xf32, #tpu.memory_space<vmem>>, vector<32x128xf32>,
    } else {
    }
    return
  }
  func.func @transform_0(%arg0: i32, %arg1: i32, %arg2: i32, %arg3: memref<2xi32, #tpu.memory_space<smem>>) -> (i32, i32, i32) {
    %c0_i32 = arith.constant 0 : i32
    return %arg1, %arg0, %arg2 : i32, i32, i32
  }
  func.func @transform_1(%arg0: i32, %arg1: i32, %arg2: i32, %arg3: memref<2xi32, #tpu.memory_space<smem>>) -> (i32, i32, i32) {
    %0 = arith.index_cast %arg1 : i32 to index
    %1 = memref.load %arg3[%0] : memref<2xi32, #tpu.memory_space<smem>>
    %c0_i32 = arith.constant 0 : i32
    %c0_i32_0 = arith.constant 0 : i32
    return %1, %arg2, %c0_i32 : i32, i32, i32
  }
  func.func @transform_2(%arg0: i32, %arg1: i32, %arg2: i32, %arg3: memref<2xi32, #tpu.memory_space<smem>>) -> (i32, i32, i32) {
    %c0_i32 = arith.constant 0 : i32
    %c0_i32_0 = arith.constant 0 : i32
    %c0_i32_1 = arith.constant 0 : i32
    return %arg1, %c0_i32, %c0_i32_0 : i32, i32, i32
  }
  func.func @transform_3(%arg0: i32, %arg1: i32, %arg2: i32, %arg3: memref<2xi32, #tpu.memory_space<smem>>) -> (i32, i32) {
    %c0_i32 = arith.constant 0 : i32
    %c0_i32_0 = arith.constant 0 : i32
    %c0_i32_1 = arith.constant 0 : i32
    return %c0_i32, %c0_i32_0 : i32, i32
  }
  func.func @transform_4(%arg0: i32, %arg1: i32, %arg2: i32, %arg3: memref<2xi32, #tpu.memory_space<smem>>) -> (i32, i32) {
    %c0_i32 = arith.constant 0 : i32
    %c0_i32_0 = arith.constant 0 : i32
    return %arg0, %c0_i32 : i32, i32
  }
}

</mosaic_0001>

<bundles_post_ra>
// kernel: tpu_custom_call.1
= control target key start
LH: loop header
LB: loop body
LE: loop exit
PB: predicated region body
PF: predicated region fallthrough
CT: control target
= control target key end

     0   :  { %s1589_s0 = inlined_call_operand.hbm [shape: s32[2], index: 0, kind: input, shape index: {}]   ;;  %s1590_s1 = inlined_call_operand.hbm [shape: bf16[2,32,128], index: 1, kind: input, shape index: {}]   ;;  %s1591_s2 = inlined_call_operand.hbm [shape: bf16[2,128,128], index: 2, kind: input, shape index: {}]   ;;  %s1592_s3 = inlined_call_operand.hbm [shape: bf16[2,128,128], index: 3, kind: input, shape index: {}]   ;;  %s1593_s4 = inlined_call_operand.vmem [shape: f32[1,128], index: 4, kind: input, shape index: {}]   ;;  %s1594_s5 = inlined_call_operand.hbm [shape: f32[32,128], index: 5, kind: output, shape index: {}]  }
   0x1   :  { %1605 = sst [smem:[#allocation20_spill]] %s1590_s1  ;;  %s979_s20 = scalar_lea.hbm %s1589_s0, 16 }
   0x2   :  { %1606 = sst [smem:[#allocation21_spill]] %s1591_s2  ;;  %p980_p0 = scmp.ne.s32.totalorder %s1589_s0, %s979_s20 }
   0x3   :  { %p983_p1 = scmp.lt.u32.totalorder %s979_s20, %s1589_s0 }
   0x5   :  { %p985_p2 = pnand %p983_p1, %p980_p0 }
   0x7   :  { %988 = shalt.err (!%p985_p2)  }
   0x8   :  { %s1195_s25 = smov [#allocation3]  }
   0x9   :  { %11 = dma.hbm_to_smem %s1589_s0, 16, %s1195_s25, [#allocation2] }
   0xa   :  { %1141 = dma.done.wait [#allocation2], 16 }
   0xb   :  { %1142 = vsyncadd [#allocation2], 4294967280 }
   0xc   :  { %13 = sfence }
   0xd   :  { %14 = vsyncpa [#allocation5], 0 }
   0xe   :  { %16 = vsyncpa [#allocation5 + $0x1], 0 }
   0xf   :  { %17 = vsyncpa [#allocation8], 0 }
  0x10   :  { %19 = vsyncpa [#allocation8 + $0x1], 0 }
  0x11   :  { %20 = vsyncpa [#allocation6], 0  ;;  %s1247_s28 = smov 0   ;;  %s1249_s29 = smov 0  }
  0x12   :  { %s1251_s30 = smov 0   ;;  %s1253_s6 = smov 0  }
  0x13   :  { %s1255_s7 = smov 0   ;;  %s1257_s8 = smov 0  }
  0x14   :  { %s1259_s0 = smov 0   ;;  %s1261_s9 = smov 0  }
  0x15   :  { %s1263_s10 = smov 0  }
  0x16 LB: > { %s1291_s11 = sadd.s32 4294967295, %s1193_s10   ;;  %s41_s12 = sadd.s32 1, %s1189_s9  ;;  %s1193_s10 = sphi %s1263_s10, %s26_s10   ;;  %s1189_s9 = sphi %s1261_s9, %s1634_s9   ;;  %s1185_s0 = sphi %s1259_s0, %s1633_s0   ;;  %s1181_s8 = sphi %s1257_s8, %s1632_s8   ;;  %s1177_s7 = sphi %s1255_s7, %s1631_s7   ;;  %s1173_s6 = sphi %s1253_s6, %s1630_s6   ;;  %s1169_s30 = sphi %s1251_s30, %s1629_s30   ;;  %s1165_s29 = sphi %s1249_s29, %s1628_s29   ;;  %s1161_s28 = sphi %s1247_s28, %s1627_s28  }
  0x17   : > { %p43_p3 = scmp.ge.s32.totalorder %s41_s12, 2  ;;  %p1597_p4 = scmp.eq.s32.totalorder %s1193_s10, 0 }
  0x18   : > { %p1596_p5 = scmp.eq.s32.totalorder %s1291_s11, 0  ;;  %s79_s13 = sld [smem:[#allocation3 + %s1189_s9]] }
  0x19   : > { %s1636_s12 = smov (%p43_p3, %s41_s12), 0  ;;  %s86_s14 = sadd.s32 1, %s1169_s30 }
  0x1a   : > { %1607 = sst [smem:[#allocation18_spill]] %s1636_s12  ;;  %p93_p6 = scmp.ne.s32.totalorder %s1169_s30, %s1165_s29 }
  0x1b   : > { %s80_s15 = sld [smem:[#allocation3 + %s1636_s12]]  ;;  %p99_p7 = scmp.ne.s32.totalorder %s1165_s29, %s1161_s28 }
  0x1c   : > { %p1306_p8 = por %p93_p6, %p1597_p4  ;;  %p1595_p10 = scmp.lt.s32.totalorder %s1193_s10, 2 }
  0x1d   : > { %p1312_p9 = por %p99_p7, %p1596_p5  ;;  %s223_s18 = sand.u32 1, %s1193_s10  }
  0x1e   : > { %s225_s19 = sand.u32 1, %s1169_s30   ;;  %p1337_p12 = pnand %p1595_p10, %p1306_p8 }
  0x1f   : > { %s1609_s17 = scalar_select %p1312_p9, 1, 0 }
  0x20   : > { %s755_s20 = sshll.u32 %s225_s19, 6  ;;  %p761_p13 = scmp.ge.s32.totalorder %s1193_s10, 1 }
  0x21   : > { %s81_s21 = ssub.s32 %s79_s13, %s80_s15  ;;  %s227_s22 = scalar_lea.vmem [#allocation7], %s755_s20 }
  0x22   : > { %p84_p11 = scmp.eq.s32.totalorder %s81_s21, 0  ;;  %s237_s23 = sshll.u32 %s227_s22, 4  ;;  %s1331_s23 = int_to_ptr.vmem [resolvable:$true] %s237_s23 }
  0x23   : > { %s856_s24 = scalar_select %p1306_p8, [#allocation3], [#allocation11] }
  0x24   : > { %s1322_s25 = scalar_select %p84_p11, %s1169_s30, %s86_s14  }
  0x25   : > { %s857_s26 = scalar_select %p1306_p8, %s1189_s9, 0 }
  0x26   : > { %s1638_s24 = smov (!%p1595_p10, %s856_s24), [#allocation12]  ;;  %p266_p0 = scmp.lt.s32.totalorder %s1193_s10, 3 }
  0x27   : > { %s1640_s26 = smov (!%p1595_p10, %s857_s26), 0  ;;  %s1612_s2 = sld [smem:[#allocation21_spill]] }
  0x28   : > { %s228_s28 = sld [smem:[%s1638_s24 + %s1640_s26]]  ;;  %p1343_p1 = pnand %p761_p13, %p266_p0 }
  0x29   : > { %s49_s16 = ssub.s32 %s1189_s9, %s1636_s12  ;;  %s1354_s21 = scalar_lea.sflag [#allocation8], %s223_s18 }
  0x2a   : > { %p991_p3 = pneg %p1337_p12 }
  0x2e   : > { %s791_s14 = sshll.u32 %s228_s28, 10  ;;  %s994_s28 = scalar_lea.hbm %s1612_s2, 2048 }
  0x2f   : > { %s1350_s20 = scalar_lea.hbm %s1612_s2, %s791_s14 }
  0x30   : > { %s989_s22 = scalar_lea.hbm %s1350_s20, 1024  ;;  %p995_p8 = scmp.lt.u32.totalorder %s1350_s20, %s1612_s2 }
  0x31   : > { %p990_p2 = scmp.ne.s32.totalorder %s1350_s20, %s989_s22  ;;  %p996_p11 = scmp.lt.u32.totalorder %s994_s28, %s989_s22 }
  0x32   : > { %p998_p0 = scmp.lt.u32.totalorder %s989_s22, %s1350_s20 }
  0x33   : > { %p992_p6 = pnand %p991_p3, %p990_p2  ;;  %p997_p13 = por %p996_p11, %p995_p8 }
  0x35   : > { %p993_p7 = pneg %p992_p6  ;;  %p999_p10 = por %p998_p0, %p997_p13 }
  0x37   : > { %p1000_p5 = pnand %p999_p10, %p993_p7 }
  0x39   : > { %1003 = shalt.err (!%p1000_p5)
}
  0x3a   : > { %s1004_s18 = scalar_lea.vmem %s1331_s23, 1024  ;;  %s1196_s19 = smov [#allocation7]  }
  0x3b   : > { %p1005_p2 = scmp.ne.s32.totalorder %s1331_s23, %s1004_s18  ;;  %s1009_s24 = sshll.u32 %s1196_s19, 4  ;;  %s1010_s24 = int_to_ptr.vmem [resolvable:$false] %s1009_s24 }
  0x3c   : > { %s1011_s26 = scalar_lea.vmem %s1010_s24, 2048  ;;  %p1012_p9 = scmp.lt.s32.totalorder %s1331_s23, %s1010_s24 }
  0x3d   : > { %p1007_p6 = pnand %p1005_p2, %p991_p3  ;;  %p1013_p8 = scmp.lt.s32.totalorder %s1011_s26, %s1004_s18 }
  0x3f   : > { %p1008_p4 = pneg %p1007_p6  ;;  %p1014_p11 = por %p1013_p8, %p1012_p9 }
  0x41   : > { %p1015_p13 = pnand %p1014_p11, %p1008_p4 }
  0x43   : > { %1018 = shalt.err (!%p1015_p13)
}
  0x44   : > { %s1599_s22 = smov 64   ;;  %s1601_s28 = smov 4  }
  0x45   : > { %875 = dma.hbm_to_vmem [thread:$0]  (!%p1337_p12), %s1350_s20, 1024, %s1331_s23, %s1354_s21, %s1599_s22, %s1599_s22, %s1601_s28  }
  0x46   : > { %p54_p4 = scmp.eq.s32.totalorder %s49_s16, 0  ;;  %s56_s14 = sadd.s32 1, %s1181_s8 }
  0x47   : > { %p63_p5 = scmp.ne.s32.totalorder %s1181_s8, %s1177_s7  ;;  %p69_p9 = scmp.ne.s32.totalorder %s1177_s7, %s1173_s6 }
  0x48   : > { %s1394_s15 = scalar_select %p54_p4, %s1181_s8, %s56_s14  }
  0x49   : > { %p1614_p10 = scmp.eq.s32.totalorder %s1193_s10, 0  ;;  %p1615_p7 = scmp.eq.s32.totalorder %s1291_s11, 0 }
  0x4a   : > { %1613 = sst [smem:[#allocation19_spill]] %s1394_s15  ;;  %s1405_s19 = sand.u32 1, %s1181_s8  }
  0x4b   : > { %p65_p3 = por %p1614_p10, %p63_p5  ;;  %p1400_p0 = por %p1615_p7, %p69_p9 }
  0x4c   : > { %s790_s23 = sshll.u32 %s1189_s9, 8  ;;  %s752_s27 = sshll.u32 %s1405_s19, 4 }
  0x4d   : > { %s1616_s18 = scalar_select %p1400_p0, 1, 0 }
  0x4e   : > { %s1617_s1 = sld [smem:[#allocation20_spill]]  ;;  %s203_s24 = scalar_lea.vmem [#allocation4], %s752_s27 }
  0x4f   : > { %s213_s26 = sshll.u32 %s203_s24, 4  ;;  %p1618_p12 = scmp.lt.s32.totalorder %s1193_s10, 2  ;;  %s1420_s26 = int_to_ptr.vmem [resolvable:$true] %s213_s26 }
  0x50   : > { %s200_s28 = scalar_lea.sflag [#allocation5], %s1405_s19 }
  0x51   : > { %p1416_p2 = pnand %p1618_p12, %p65_p3 }
  0x53   : > { %p1021_p8 = pneg %p1416_p2 }
  0x54   : > { %s1412_s6 = scalar_lea.hbm %s1617_s1, %s790_s23  ;;  %s1024_s16 = scalar_lea.hbm %s1617_s1, 512 }
  0x55   : > { %s1019_s20 = scalar_lea.hbm %s1412_s6, 256  ;;  %p1025_p4 = scmp.lt.u32.totalorder %s1412_s6, %s1617_s1 }
  0x56   : > { %p1020_p6 = scmp.ne.s32.totalorder %s1412_s6, %s1019_s20  ;;  %p1026_p5 = scmp.lt.u32.totalorder %s1024_s16, %s1019_s20 }
  0x57   : > { %p1028_p10 = scmp.lt.u32.totalorder %s1019_s20, %s1412_s6 }
  0x58   : > { %p1022_p11 = pnand %p1021_p8, %p1020_p6  ;;  %p1027_p9 = por %p1026_p5, %p1025_p4 }
  0x5a   : > { %p1023_p13 = pneg %p1022_p11  ;;  %p1029_p3 = por %p1028_p10, %p1027_p9 }
  0x5c   : > { %p1030_p7 = pnand %p1029_p3, %p1023_p13 }
  0x5e   : > { %1033 = shalt.err (!%p1030_p7)
}
  0x5f   : > { %s1034_s22 = scalar_lea.vmem %s1420_s26, 256  ;;  %s1199_s23 = smov [#allocation4]  }
  0x60   : > { %p1035_p12 = scmp.ne.s32.totalorder %s1420_s26, %s1034_s22  ;;  %s1039_s27 = sshll.u32 %s1199_s23, 4  ;;  %s1040_s27 = int_to_ptr.vmem [resolvable:$false] %s1039_s27 }
  0x61   : > { %s1041_s2 = scalar_lea.vmem %s1040_s27, 512  ;;  %p1042_p0 = scmp.lt.s32.totalorder %s1420_s26, %s1040_s27 }
  0x62   : > { %p1037_p6 = pnand %p1035_p12, %p1021_p8  ;;  %p1043_p4 = scmp.lt.s32.totalorder %s1041_s2, %s1034_s22 }
  0x64   : > { %p1038_p11 = pneg %p1037_p6  ;;  %p1044_p5 = por %p1043_p4, %p1042_p0 }
  0x66   : > { %p1045_p9 = pnand %p1044_p5, %p1038_p11 }
  0x68   : > { %1048 = shalt.err (!%p1045_p9)
}
  0x69   : > { %s1620_s20 = smov 4   ;;  %s1621_s16 = smov 64  }
  0x6a   : > { %870 = dma.hbm_to_vmem [thread:$0]  (!%p1416_p2), %s1412_s6, 256, %s1420_s26, %s200_s28, %s1621_s16, %s1621_s16, %s1620_s20  }
  0x6b   : > { %s792_s24 = sshll.u32 %s1189_s9, 10  ;;  %s1622_s23 = sshll.u32 %s1405_s19, 6 }
  0x6c   : > { %s251_s27 = scalar_lea.vmem [#allocation9], %s1622_s23  ;;  %s1460_s12 = scalar_lea.hbm %s1592_s3, %s792_s24 }
  0x6d   : > { %s258_s22 = sshll.u32 %s251_s27, 4  ;;  %s1049_s15 = scalar_lea.hbm %s1460_s12, 1024  ;;  %s1462_s22 = int_to_ptr.vmem [resolvable:$true] %s258_s22 }
  0x6e   : > { %p1050_p0 = scmp.ne.s32.totalorder %s1460_s12, %s1049_s15  ;;  %s1054_s6 = scalar_lea.hbm %s1592_s3, 2048 }
  0x6f   : > { %p1055_p3 = scmp.lt.u32.totalorder %s1460_s12, %s1592_s3  ;;  %p1056_p7 = scmp.lt.u32.totalorder %s1054_s6, %s1049_s15 }
  0x70   : > { %p1052_p13 = pnand %p1050_p0, %p1021_p8  ;;  %p1058_p6 = scmp.lt.u32.totalorder %s1049_s15, %s1460_s12 }
  0x71   : > { %p1057_p12 = por %p1056_p7, %p1055_p3 }
  0x72   : > { %p1053_p10 = pneg %p1052_p13 }
  0x73   : > { %p1059_p11 = por %p1058_p6, %p1057_p12 }
  0x75   : > { %p1060_p4 = pnand %p1059_p11, %p1053_p10 }
  0x77   : > { %1063 = shalt.err (!%p1060_p4)
}
  0x78   : > { %s1064_s24 = scalar_lea.vmem %s1462_s22, 1024  ;;  %s1200_s23 = smov [#allocation9]  }
  0x79   : > { %p1065_p5 = scmp.ne.s32.totalorder %s1462_s22, %s1064_s24  ;;  %s1069_s27 = sshll.u32 %s1200_s23, 4  ;;  %s1070_s27 = int_to_ptr.vmem [resolvable:$false] %s1069_s27 }
  0x7a   : > { %s1071_s2 = scalar_lea.vmem %s1070_s27, 2048  ;;  %p1072_p13 = scmp.lt.s32.totalorder %s1462_s22, %s1070_s27 }
  0x7b   : > { %p1067_p9 = pnand %p1065_p5, %p1021_p8  ;;  %p1073_p3 = scmp.lt.s32.totalorder %s1071_s2, %s1064_s24 }
  0x7d   : > { %p1068_p0 = pneg %p1067_p9  ;;  %p1074_p7 = por %p1073_p3, %p1072_p13 }
  0x7f   : > { %p1075_p12 = pnand %p1074_p7, %p1068_p0 }
  0x81   : > { %1078 = shalt.err (!%p1075_p12)
}
  0x82   : > { %878 = dma.hbm_to_vmem [thread:$0]  (!%p1416_p2), %s1460_s12, 1024, %s1462_s22, %s1354_s21, %s1621_s16, %s1621_s16, %s1620_s20  }
  0x83   : > { %270 = sbr.rel (%p1343_p1) target bundleno = 663 (0x297), region = 36  ;;  %s272_s15 = sand.u32 (!%p1343_p1), 1, %s1177_s7  }
  0x84   : > { %s762_s28 = sshll.u32 (!%p1343_p1), %s272_s15, 4  ;;  %s273_s19 = scalar_lea.sflag (!%p1343_p1), [#allocation5], %s272_s15 }
  0x85   : > { %s1494_s6 = scalar_lea.vmem (!%p1343_p1), [#allocation4], %s762_s28  ;;  %p1623_p8 = scmp.ne.s32.totalorder (!%p1343_p1), %s1616_s18, 0 }
  0x8a   : > { %1144 = dma.done.wait (%p1623_p8), %s273_s19, 256  }
  0x8b   : > { %1146 = vsyncadd (%p1623_p8), %s273_s19, 4294967040  ;;  %s281_s14 = sand.u32 1, %s1291_s11   ;;  %s283_s12 = sand.u32 1, %s1165_s29  }
  0x8c   : > { %s763_s21 = sshll.u32 %s283_s12, 6  ;;  %s282_s13 = scalar_lea.sflag [#allocation8], %s281_s14 }
  0x8d   : > { %s1502_s20 = scalar_lea.vmem [#allocation7], %s763_s21  ;;  %p1624_p1 = scmp.ne.s32.totalorder %s1609_s17, 0 }
  0x8f   : > { %1148 = dma.done.wait (%p1624_p1), %s282_s13, 1024  }
  0x90   : > { %1150 = vsyncadd (%p1624_p1), %s282_s13, 4294966272  ;;  %s764_s16 = sshll.u32 %s272_s15, 6 }
  0x91   : > { %s1508_s22 = scalar_lea.vmem [#allocation9], %s764_s16 }
  0x92   : > { %1152 = dma.done.wait (%p1623_p8), %s282_s13, 1024  }
  0x93   : > { %1154 = vsyncadd (%p1623_p8), %s282_s13, 4294966272  ;;  %p329_p2 = scmp.eq.s32.totalorder %s1185_s0, 0 }
  0x94   : > { %v1201_v0 = vmov (%p329_p2), 0.0  }
  0x95   : > { %334 = sbr.rel (!%p329_p2) target bundleno = 156 (0x9c), region = 52  ;;  %335 = vst [vmem:[#allocation10] sm:$0xff] (%p329_p2), %v1201_v0  ;;  %336 = vst [vmem:[#allocation10 + $0x8] sm:$0xff] (%p329_p2), %v1201_v0 }
  0x96   : > { %337 = vst [vmem:[#allocation10 + $0x10] sm:$0xff] (%p329_p2), %v1201_v0  ;;  %338 = vst [vmem:[#allocation10 + $0x18] sm:$0xff] (%p329_p2), %v1201_v0 }
  0x9c PF: > { %v961_v1 = vld [vmem:[%s1502_s20] sm:$0xff]   ;;  %v962_v2 = vld [vmem:[%s1502_s20 + $0x8] sm:$0xff]   ;;  %v963_v3 = vld [vmem:[%s1502_s20 + $0x10] sm:$0xff]   ;;  %p595_p10 = scmp.eq.s32.totalorder %s1185_s0, 1 }
  0x9d   : > { %815 = vmatprep.subr.bf16.mxu0 %v961_v1  ;;  %v964_v4 = vld [vmem:[%s1502_s20 + $0x18] sm:$0xff]   ;;  %v969_v5 = vld [vmem:[%s1494_s6] sm:$0xff]   ;;  %v972_v7 = vld [vmem:[%s1508_s22 + $0x8] sm:$0xff]  }
  0x9e   : > { %816 = vmatpush3.bf16.msra.mxu0 %v961_v1  ;;  %831 = vmatprep.mubr.bf16.mxu0 %v969_v5  ;;  %v971_v6 = vld [vmem:[%s1508_s22] sm:$0xff]   ;;  %v973_v9 = vld [vmem:[%s1508_s22 + $0x10] sm:$0xff]   ;;  %v966_v10 = vld [vmem:[%s1502_s20 + $0x28] sm:$0xff]  }
  0x9f   : > { %817 = vmatprep.subr.bf16.mxu0 %v962_v2  ;;  %v965_v8 = vld [vmem:[%s1502_s20 + $0x20] sm:$0xff]   ;;  %835 = vmatprep.subr.bf16.mxu1 %v971_v6  ;;  %v974_v11 = vld [vmem:[%s1508_s22 + $0x18] sm:$0xff]   ;;  %v967_v12 = vld [vmem:[%s1502_s20 + $0x30] sm:$0xff]  }
  0xa0   : > { %836 = vmatpush3.bf16.msra.mxu1 %v971_v6  ;;  %v975_v13 = vld [vmem:[%s1508_s22 + $0x20] sm:$0xff]   ;;  %v968_v14 = vld [vmem:[%s1502_s20 + $0x38] sm:$0xff]   ;;  %v976_v15 = vld [vmem:[%s1508_s22 + $0x28] sm:$0xff]  }
  0xa1   : > { %837 = vmatprep.subr.bf16.mxu1 %v972_v7  ;;  %v970_v16 = vld [vmem:[%s1494_s6 + $0x8] sm:$0xff]   ;;  %v977_v17 = vld [vmem:[%s1508_s22 + $0x30] sm:$0xff]   ;;  %v583_v26 = vld [vmem:[#allocation10] sm:$0xff] }
  0xa2   : > { %818 = vmatpush3.bf16.msra.mxu0 %v962_v2  ;;  %v978_v18 = vld [vmem:[%s1508_s22 + $0x38] sm:$0xff]   ;;  %v585_v25 = vld [vmem:[#allocation10 + $0x10] sm:$0xff]  ;;  %v584_v31 = vld [vmem:[#allocation10 + $0x8] sm:$0xff] }
  0xa3   : > { %819 = vmatprep.subr.bf16.mxu0 %v963_v3  ;;  %v586_v28 = vld [vmem:[#allocation10 + $0x18] sm:$0xff]  ;;  %v785_v38 = vld [vmem:[%s1593_s4] ss:$0 sm:$0xff] (%p595_p10) }
  0xa4   : > { %838 = vmatpush3.bf16.msra.mxu1 %v972_v7 }
  0xa5   : > { %839 = vmatprep.subr.bf16.mxu1 %v973_v9 }
  0xa6   : > { %820 = vmatpush3.bf16.msra.mxu0 %v963_v3 }
  0xa7   : > { %821 = vmatprep.subr.bf16.mxu0 %v964_v4 }
  0xa8   : > { %840 = vmatpush3.bf16.msra.mxu1 %v973_v9 }
  0xa9   : > { %841 = vmatprep.subr.bf16.mxu1 %v974_v11 }
  0xaa   : > { %822 = vmatpush3.bf16.msra.mxu0 %v964_v4 }
  0xab   : > { %823 = vmatprep.subr.bf16.mxu0 %v965_v8 }
  0xac   : > { %842 = vmatpush3.bf16.msra.mxu1 %v974_v11 }
  0xad   : > { %843 = vmatprep.subr.bf16.mxu1 %v975_v13 }
  0xae   : > { %824 = vmatpush3.bf16.msra.mxu0 %v965_v8 }
  0xaf   : > { %825 = vmatprep.subr.bf16.mxu0 %v966_v10 }
  0xb0   : > { %844 = vmatpush3.bf16.msra.mxu1 %v975_v13 }
  0xb1   : > { %845 = vmatprep.subr.bf16.mxu1 %v976_v15 }
  0xb2   : > { %826 = vmatpush3.bf16.msra.mxu0 %v966_v10 }
  0xb3   : > { %827 = vmatprep.subr.bf16.mxu0 %v967_v12 }
  0xb4   : > { %846 = vmatpush3.bf16.msra.mxu1 %v976_v15 }
  0xb5   : > { %847 = vmatprep.subr.bf16.mxu1 %v977_v17 }
  0xb6   : > { %828 = vmatpush3.bf16.msra.mxu0 %v967_v12 }
  0xb7   : > { %829 = vmatprep.subr.bf16.mxu0 %v968_v14 }
  0xb8   : > { %848 = vmatpush3.bf16.msra.mxu1 %v977_v17 }
  0xb9   : > { %849 = vmatprep.subr.bf16.mxu1 %v978_v18 }
  0xba   : > { %830 = vmatpush3.bf16.msra.mxu0 %v968_v14 }
  0xbc   : > { %850 = vmatpush3.bf16.msra.mxu1 %v978_v18 }
  0xbd   : > { %832 = vmatmul.mubr.bf16.vlgmr.msra.gmra.mrb[0].mxu0 %v970_v16 }
 0x190   : > { %v833_v19 = vpop.f32.mrb[0].mxu0 }
 0x191   : > { %v469_v20 = vpop.f32.mrb[1].mxu0 }
 0x192   : > { %v834_v21 = vpop.f32.mrb[2].mxu0 }
 0x193   : > { %v485_v22 = vpack.c.bf16 %v834_v21, %v833_v19  ;;  %v472_v23 = vpop.f32.mrb[3].mxu0 }
 0x194   : > { %v484_v24 = vpack.c.bf16 %v472_v23, %v469_v20 }
 0x196   : > { %851 = vmatprep.mubr.bf16.mxu1 %v484_v24 }
 0x197   : > { %852 = vmatmul.mubr.bf16.vlgmr.msra.gmra.mrb[0].mxu1 %v485_v22 }
 0x26a   : > { %v853_v27 = vpop.f32.mrb[0].mxu1  ;;  %599 = sbr.rel (!%p595_p10) target bundleno = 637 (0x27d), region = 56 }
 0x26b   : > { %v589_v29 = vadd.f32 %v853_v27, %v585_v25  ;;  %v568_v30 = vpop.f32.mrb[1].mxu1 }
 0x26c   : > { %v587_v32 = vadd.f32 %v583_v26, %v568_v30  ;;  %v854_v33 = vpop.f32.mrb[2].mxu1 }
 0x26d   : > { %593 = vst [vmem:[#allocation10 + $0x10] sm:$0xff] %v589_v29  ;;  %v590_v34 = vadd.f32 %v854_v33, %v586_v28  ;;  %v571_v35 = vpop.f32.mrb[3].mxu1 }
 0x26e   : > { %591 = vst [vmem:[#allocation10] sm:$0xff] %v587_v32  ;;  %v588_v36 = vadd.f32 %v584_v31, %v571_v35 }
 0x26f   : > { %594 = vst [vmem:[#allocation10 + $0x18] sm:$0xff] %v590_v34 }
 0x270   : > { %592 = vst [vmem:[#allocation10 + $0x8] sm:$0xff] %v588_v36 }
 0x274   : > { %v602_v42 = vld [vmem:[#allocation10 + $0x10] sm:$0xff] }
 0x275   : > { %v600_v37 = vld [vmem:[#allocation10] sm:$0xff]  ;;  %v613_v44 = vadd.f32 %v785_v38, %v602_v42 }
 0x276   : > { %v611_v40 = vadd.f32 %v785_v38, %v600_v37  ;;  %v603_v43 = vld [vmem:[#allocation10 + $0x18] sm:$0xff] }
 0x277   : > { %v601_v39 = vld [vmem:[#allocation10 + $0x8] sm:$0xff]  ;;  %v614_v45 = vadd.f32 %v785_v38, %v603_v43  ;;  %v617_v48 = vmax.f32 %v613_v44, 0.0 }
 0x278   : > { %v612_v41 = vadd.f32 %v785_v38, %v601_v39  ;;  %v615_v46 = vmax.f32 %v611_v40, 0.0 }
 0x279   : > { %v618_v49 = vmax.f32 %v614_v45, 0.0  ;;  %621 = vst [vmem:[#allocation10 + $0x10] sm:$0xff] %v617_v48 }
 0x27a   : > { %v616_v47 = vmax.f32 %v612_v41, 0.0  ;;  %619 = vst [vmem:[#allocation10] sm:$0xff] %v615_v46 }
 0x27b   : > { %622 = vst [vmem:[#allocation10 + $0x18] sm:$0xff] %v618_v49 }
 0x27c   : > { %620 = vst [vmem:[#allocation10 + $0x8] sm:$0xff] %v616_v47 }
 0x27d PF: > { %p880_p6 = scmp.eq.s32.totalorder %s1291_s11, 1  ;;  %s1202_s0 = smov [#allocation10]  }
 0x27e   : > { %s632_s26 = sshll.u32 %s1202_s0, 4  ;;  %s633_s26 = int_to_ptr.vmem [resolvable:$true] %s632_s26 }
 0x27f   : > { %s1079_s1 = scalar_lea.vmem %s633_s26, 512  ;;  %p1086_p9 = scmp.lt.s32.totalorder %s633_s26, %s633_s26 }
 0x280   : > { %p1080_p11 = scmp.ne.s32.totalorder %s633_s26, %s1079_s1  ;;  %p1087_p0 = scmp.lt.s32.totalorder %s1079_s1, %s1079_s1 }
 0x282   : > { %p1081_p4 = pnand %p1080_p11, %p880_p6  ;;  %p1088_p13 = por %p1087_p0, %p1086_p9 }
 0x284   : > { %p1082_p5 = pneg %p1081_p4 }
 0x286   : > { %p1089_p3 = pnand %p1088_p13, %p1082_p5 }
 0x288   : > { %1092 = shalt.err (!%p1089_p3)
}
 0x289   : > { %s1093_s27 = scalar_lea.hbm %s1594_s5, 512 }
 0x28a   : > { %p1094_p7 = scmp.ne.s32.totalorder %s1594_s5, %s1093_s27  ;;  %p1099_p1 = scmp.lt.u32.totalorder %s1093_s27, %s1594_s5 }
 0x28c   : > { %p1095_p12 = pnand %p1094_p7, %p880_p6 }
 0x28e   : > { %p1096_p8 = pneg %p1095_p12 }
 0x290   : > { %p1101_p2 = pnand %p1099_p1, %p1096_p8 }
 0x292   : > { %1104 = shalt.err (!%p1101_p2)
}
 0x293   : > { %s1203_s6 = smov 128   ;;  %s1204_s14 = smov 8  }
 0x294   : > { %864 = dma.vmem_to_hbm [thread:$0]  (%p880_p6), %s633_s26, 512, %s1594_s5, [#allocation6], %s1203_s6, %s1203_s6, %s1204_s14  }
 0x295   : > { %1156 = dma.done.wait (%p880_p6), [#allocation6], 512  }
 0x296   : > { %1158 = vsyncadd (%p880_p6), [#allocation6], 4294966784 }
 0x297 PF: > { %s26_s10 = sadd.s32 1, %s1193_s10   ;;  %s1625_s13 = sld [smem:[#allocation19_spill]] }
 0x298   : > { %p23_p10 = scmp.ge.s32.totalorder %s26_s10, 4   ;;  %s1626_s20 = sld [smem:[#allocation18_spill]] }
 0x299   : > { %s1627_s28 = smov %s1165_s29  ;;  %s1628_s29 = smov %s1169_s30 }
 0x29a   : > { %s1629_s30 = smov %s1322_s25  ;;  %s1630_s6 = smov %s1177_s7 }
 0x29b   : > { %s1631_s7 = smov %s1181_s8  ;;  %s1633_s0 = smov %s1189_s9 }
 0x29c   :  { %25 = sbr.rel (!%p23_p10) target bundleno = 22 (0x16), region = 106 }
 0x29d   : > { %s1632_s8 = smov %s1625_s13 }
 0x29e   : > { %s1634_s9 = smov %s1626_s20 }
 0x2a3   :  { %648 = vsyncpa [#allocation5], 1 }
 0x2a4   :  { %650 = vsyncpa [#allocation5 + $0x1], 1 }
 0x2a5   :  { %651 = vsyncpa [#allocation8], 1 }
 0x2a6   :  { %653 = vsyncpa [#allocation8 + $0x1], 1 }
 0x2a7   :  { %654 = vsyncpa [#allocation6], 1 }
 0x2a8   :  { %656 = vsyncpa [#allocation6 + $0x1], 1 }

</bundles_post_ra>
